<compile_context>
chip_gen: v7x
topology: tpu7x:2x2x1
jax: 0.10.0
libtpu: 0.0.40
codegen_flags: <defaults>
</compile_context>

<pallas_src>
import jax
import jax.numpy as jnp
from jax.experimental import pallas as pl
from jax.experimental.pallas import tpu as pltpu

_LANE = 128          # lane width: pad hidden dims and the action dim to multiples of 128
_NEG_BIAS = -1e9     # bias for padded logit columns -> softmax prob exactly 0


def _round_up(x, m):
    return ((x + m - 1) // m) * m


def _cdiv(a, b):
    return (a + b - 1) // b


def _policy_mlp_kernel(x_ref, w1_ref, b1_ref, w2_ref, b2_ref, w3_ref, b3_ref, out_ref):
    """Fused Linear->ReLU->Linear->ReLU->Linear->Softmax for one batch tile.

    Weights arrive bf16 (cast once in the wrapper); activations are cast to bf16 only as
    MXU operands, accumulation and all VPU work (bias, ReLU, softmax) stay f32.
    """
    x = x_ref[...].astype(jnp.bfloat16)

    h1 = jnp.dot(x, w1_ref[...], preferred_element_type=jnp.float32) + b1_ref[...]
    h1 = jnp.maximum(h1, 0.0)

    h2 = jnp.dot(h1.astype(jnp.bfloat16), w2_ref[...],
                 preferred_element_type=jnp.float32) + b2_ref[...]
    h2 = jnp.maximum(h2, 0.0)

    logits = jnp.dot(h2.astype(jnp.bfloat16), w3_ref[...],
                     preferred_element_type=jnp.float32) + b3_ref[...]

    # Numerically stable softmax along the lane-dense 128-wide last axis. Padded columns
    # carry a -1e9 bias -> exp underflows to 0 there; normalization over real actions is exact.
    m = jnp.max(logits, axis=-1, keepdims=True)
    e = jnp.exp(logits - m)
    denom = jnp.sum(e, axis=-1, keepdims=True)
    probs = e / denom          # exact division: not VPU/EUP-bound, removes ~5e-3 row-sum bias

    out_ref[...] = probs.astype(out_ref.dtype)


def policy_forward(state, params, *, max_tile_b=1024, slice_output=True):
    """state: (B, state_dim) float32; params: dict w1,b1,w2,b2,w3,b3 in (in, out) layout."""
    w1, b1 = params["w1"], params["b1"]
    w2, b2 = params["w2"], params["b2"]
    w3, b3 = params["w3"], params["b3"]
    B, state_dim = state.shape
    h1_dim = w1.shape[1]
    h2_dim = w2.shape[1]
    action_dim = w3.shape[1]

    # --- lane-dense layers: pad hidden dims and action dim to multiples of 128 ------------
    h1_pad = _round_up(h1_dim, _LANE)
    h2_pad = _round_up(h2_dim, _LANE)
    a_pad = _round_up(action_dim, _LANE)

    # Weights -> bf16 (native MXU rate, half the VMEM); biases stay f32 (added post-accumulate).
    # Padded hidden columns are dead: zero in-weights + zero bias -> ReLU(0)=0 -> zero out-weights.
    w1p = jnp.zeros((state_dim, h1_pad), jnp.bfloat16).at[:, :h1_dim].set(w1.astype(jnp.bfloat16))
    b1p = jnp.zeros((1, h1_pad), jnp.float32).at[:, :h1_dim].set(b1.astype(jnp.float32))
    w2p = jnp.zeros((h1_pad, h2_pad), jnp.bfloat16).at[:h1_dim, :h2_dim].set(w2.astype(jnp.bfloat16))
    b2p = jnp.zeros((1, h2_pad), jnp.float32).at[:, :h2_dim].set(b2.astype(jnp.float32))
    w3p = jnp.zeros((h2_pad, a_pad), jnp.bfloat16).at[:h2_dim, :action_dim].set(w3.astype(jnp.bfloat16))
    b3p = jnp.full((1, a_pad), _NEG_BIAS, jnp.float32).at[:, :action_dim].set(b3.astype(jnp.float32))

    # --- batch tiling: even-split (minimal padding), >= 2 grid steps when B >= 16 so the
    # "parallel" batch axis has work for both v7x TensorCores; tile rows are multiples of 8.
    if B >= 16:
        n_tiles = 2 * max(1, _cdiv(B, 2 * max_tile_b))
    else:
        n_tiles = 1
    tile_b = _round_up(_cdiv(max(B, 1), n_tiles), 8)
    b_padded = tile_b * n_tiles

    if b_padded != B:
        state_p = jnp.zeros((b_padded, state_dim), state.dtype).at[:B, :].set(state)
    else:
        state_p = state

    pinned = lambda i: (0, 0)   # weights/biases stay VMEM-resident across grid steps

    flops = 2 * b_padded * (state_dim * h1_pad + h1_pad * h2_pad + h2_pad * a_pad)
    bytes_accessed = (
        4 * (b_padded * state_dim + b_padded * a_pad + h1_pad + h2_pad + a_pad)   # f32 acts/biases
        + 2 * (state_dim * h1_pad + h1_pad * h2_pad + h2_pad * a_pad)             # bf16 weights
    )
    cost = pl.CostEstimate(
        flops=flops, transcendentals=b_padded * a_pad, bytes_accessed=bytes_accessed
    )

    out_padded = pl.pallas_call(
        _policy_mlp_kernel,
        out_shape=jax.ShapeDtypeStruct((b_padded, a_pad), jnp.float32),
        grid_spec=pltpu.PrefetchScalarGridSpec(
            num_scalar_prefetch=0,
            grid=(n_tiles,),
            in_specs=[
                pl.BlockSpec((tile_b, state_dim), lambda i: (i, 0)),  # activations: batch-tiled
                pl.BlockSpec((state_dim, h1_pad), pinned),
                pl.BlockSpec((1, h1_pad), pinned),
                pl.BlockSpec((h1_pad, h2_pad), pinned),
                pl.BlockSpec((1, h2_pad), pinned),
                pl.BlockSpec((h2_pad, a_pad), pinned),
                pl.BlockSpec((1, a_pad), pinned),
            ],
            out_specs=pl.BlockSpec((tile_b, a_pad), lambda i: (i, 0)),
        ),
        compiler_params=pltpu.CompilerParams(
            dimension_semantics=("parallel",),   # shard batch tiles across TCs on v7x
        ),
        cost_estimate=cost,
    )(state_p, w1p, b1p, w2p, b2p, w3p, b3p)

    if slice_output:
        # TODO(synk): consumers that can handle the padded (b_padded, 128) buffer should pass
        # slice_output=False to skip this extra HBM read/write pass over the output.
        return out_padded[:B, :action_dim]
    return out_padded


def policy_forward_ref(state, params):
    """Pure-JAX f32 reference matching the PyTorch module."""
    x = jnp.maximum(state @ params["w1"] + params["b1"], 0.0)
    x = jnp.maximum(x @ params["w2"] + params["b2"], 0.0)
    logits = x @ params["w3"] + params["b3"]
    return jax.nn.softmax(logits, axis=-1)


def init_policy_params(key, state_dim, action_dim, hidden_layers=(64, 64)):
    """Deterministic init mirroring torch.nn.Linear default (U(-1/sqrt(fan_in), 1/sqrt(fan_in)))."""
    dims = [state_dim, *hidden_layers, action_dim]
    params = {}
    for i in range(len(dims) - 1):
        fan_in, fan_out = dims[i], dims[i + 1]
        key, kw, kb = jax.random.split(key, 3)
        bound = 1.0 / jnp.sqrt(jnp.float32(fan_in))
        # stored as (in, out); biases as (1, out) for clean 2-D broadcasting on TPU
        params[f"w{i + 1}"] = jax.random.uniform(
            kw, (fan_in, fan_out), jnp.float32, minval=-bound, maxval=bound
        )
        params[f"b{i + 1}"] = jax.random.uniform(
            kb, (1, fan_out), jnp.float32, minval=-bound, maxval=bound
        )
    return params


if __name__ == "__main__":
    key = jax.random.PRNGKey(0)

    state_dim = 8
    action_dim = 6
    hidden_layers = (64, 64)

    params = init_policy_params(key, state_dim, action_dim, hidden_layers)

    # Test 1: small batch (single-tile path, grid=(1,))
    key, k1 = jax.random.split(key)
    state_small = jax.random.normal(k1, (4, state_dim), jnp.float32)
    probs_small = jax.block_until_ready(policy_forward(state_small, params))
    assert probs_small.shape == (4, action_dim)
    # exact-division softmax: rows sum to 1 tightly
    assert jnp.allclose(jnp.sum(probs_small, axis=-1), 1.0, atol=1e-5)
    ref_small = policy_forward_ref(state_small, params)
    # bf16 MXU operands with f32 accumulation -> small deviation from the f32 reference
    assert jnp.allclose(probs_small, ref_small, atol=2e-2, rtol=0.0)

    # Test 2: batch >= 16 exercises the multi-tile (grid=(2,)) megacore path
    key, k2 = jax.random.split(key)
    state_med = jax.random.normal(k2, (20, state_dim), jnp.float32)
    probs_med = jax.block_until_ready(policy_forward(state_med, params))
    assert probs_med.shape == (20, action_dim)
    assert jnp.allclose(jnp.sum(probs_med, axis=-1), 1.0, atol=1e-5)
    ref_med = policy_forward_ref(state_med, params)
    assert jnp.allclose(probs_med, ref_med, atol=2e-2, rtol=0.0)

    print("KERNEL_OK")
</pallas_src>

<mosaic_0001>
module attributes {stable_mosaic.version = 11 : i64} {
  func.func @_policy_mlp_kernel(%arg0: i32, %arg1: memref<8x8xf32, #tpu.memory_space<vmem>>, %arg2: memref<8x128xbf16, #tpu.memory_space<vmem>>, %arg3: memref<1x128xf32, #tpu.memory_space<vmem>>, %arg4: memref<128x128xbf16, #tpu.memory_space<vmem>>, %arg5: memref<1x128xf32, #tpu.memory_space<vmem>>, %arg6: memref<128x128xbf16, #tpu.memory_space<vmem>>, %arg7: memref<1x128xf32, #tpu.memory_space<vmem>>, %arg8: memref<8x128xf32, #tpu.memory_space<vmem>>) attributes {dimension_semantics = [#tpu.dimension_semantics<parallel>], iteration_bounds = array<i64: 1>, scalar_prefetch = 0 : i64, scratch_operands = 0 : i64, tpu.core_type = #tpu.core_type<tc>, window_params = [{transform_indices = @transform_0, window_bounds = array<i64: 8, 8>}, {pipeline_mode = #tpu.pipeline_mode<synchronous>, transform_indices = @transform_1, window_bounds = array<i64: 8, 128>}, {pipeline_mode = #tpu.pipeline_mode<synchronous>, transform_indices = @transform_2, window_bounds = array<i64: 1, 128>}, {pipeline_mode = #tpu.pipeline_mode<synchronous>, transform_indices = @transform_3, window_bounds = array<i64: 128, 128>}, {pipeline_mode = #tpu.pipeline_mode<synchronous>, transform_indices = @transform_4, window_bounds = array<i64: 1, 128>}, {pipeline_mode = #tpu.pipeline_mode<synchronous>, transform_indices = @transform_5, window_bounds = array<i64: 128, 128>}, {pipeline_mode = #tpu.pipeline_mode<synchronous>, transform_indices = @transform_6, window_bounds = array<i64: 1, 128>}, {transform_indices = @transform_7, window_bounds = array<i64: 8, 128>}]} {
    %c0 = arith.constant 0 : index
    %c0_0 = arith.constant 0 : index
    %0 = vector.load %arg1[%c0, %c0_0] : memref<8x8xf32, #tpu.memory_space<vmem>>, vector<8x8xf32>
    %1 = arith.truncf %0 : vector<8x8xf32> to vector<8x8xbf16>
    %c0_1 = arith.constant 0 : index
    %c0_2 = arith.constant 0 : index
    %2 = vector.load %arg2[%c0_1, %c0_2] : memref<8x128xbf16, #tpu.memory_space<vmem>>, vector<8x128xbf16>
    %cst = arith.constant dense<0.000000e+00> : vector<8x128xf32>
    %3 = tpu.matmul %1, %2, %cst {dimension_numbers = #tpu.dot_dimension_numbers<[1], [0], [0], [1], [0, 0, 1, 1], [], []>} : vector<8x8xbf16>, vector<8x128xbf16>, vector<8x128xf32> -> vector<8x128xf32>
    %c0_3 = arith.constant 0 : index
    %c0_4 = arith.constant 0 : index
    %4 = vector.load %arg3[%c0_3, %c0_4] : memref<1x128xf32, #tpu.memory_space<vmem>>, vector<1x128xf32>
    %5 = vector.broadcast %4 : vector<1x128xf32> to vector<8x128xf32>
    %6 = arith.addf %3, %5 : vector<8x128xf32>
    %cst_5 = arith.constant 0.000000e+00 : f32
    %7 = vector.broadcast %cst_5 : f32 to vector<8x128xf32>
    %8 = arith.maximumf %6, %7 : vector<8x128xf32>
    %9 = arith.truncf %8 : vector<8x128xf32> to vector<8x128xbf16>
    %c0_6 = arith.constant 0 : index
    %c0_7 = arith.constant 0 : index
    %10 = vector.load %arg4[%c0_6, %c0_7] : memref<128x128xbf16, #tpu.memory_space<vmem>>, vector<128x128xbf16>
    %cst_8 = arith.constant dense<0.000000e+00> : vector<8x128xf32>
    %11 = tpu.matmul %9, %10, %cst_8 {dimension_numbers = #tpu.dot_dimension_numbers<[1], [0], [0], [1], [0, 0, 1, 1], [], []>} : vector<8x128xbf16>, vector<128x128xbf16>, vector<8x128xf32> -> vector<8x128xf32>
    %c0_9 = arith.constant 0 : index
    %c0_10 = arith.constant 0 : index
    %12 = vector.load %arg5[%c0_9, %c0_10] : memref<1x128xf32, #tpu.memory_space<vmem>>, vector<1x128xf32>
    %13 = vector.broadcast %12 : vector<1x128xf32> to vector<8x128xf32>
    %14 = arith.addf %11, %13 : vector<8x128xf32>
    %cst_11 = arith.constant 0.000000e+00 : f32
    %15 = vector.broadcast %cst_11 : f32 to vector<8x128xf32>
    %16 = arith.maximumf %14, %15 : vector<8x128xf32>
    %17 = arith.truncf %16 : vector<8x128xf32> to vector<8x128xbf16>
    %c0_12 = arith.constant 0 : index
    %c0_13 = arith.constant 0 : index
    %18 = vector.load %arg6[%c0_12, %c0_13] : memref<128x128xbf16, #tpu.memory_space<vmem>>, vector<128x128xbf16>
    %cst_14 = arith.constant dense<0.000000e+00> : vector<8x128xf32>
    %19 = tpu.matmul %17, %18, %cst_14 {dimension_numbers = #tpu.dot_dimension_numbers<[1], [0], [0], [1], [0, 0, 1, 1], [], []>} : vector<8x128xbf16>, vector<128x128xbf16>, vector<8x128xf32> -> vector<8x128xf32>
    %c0_15 = arith.constant 0 : index
    %c0_16 = arith.constant 0 : index
    %20 = vector.load %arg7[%c0_15, %c0_16] : memref<1x128xf32, #tpu.memory_space<vmem>>, vector<1x128xf32>
    %21 = vector.broadcast %20 : vector<1x128xf32> to vector<8x128xf32>
    %22 = arith.addf %19, %21 : vector<8x128xf32>
    %cst_17 = arith.constant dense<0xFF800000> : vector<8xf32>
    %23 = vector.multi_reduction <maximumf>, %22, %cst_17 [1] : vector<8x128xf32> to vector<8xf32>
    %24 = vector.shape_cast %23 : vector<8xf32> to vector<8x1xf32>
    %25 = vector.broadcast %24 : vector<8x1xf32> to vector<8x128xf32>
    %26 = arith.subf %22, %25 : vector<8x128xf32>
    %27 = math.exp %26 : vector<8x128xf32>
    %cst_18 = arith.constant dense<0.000000e+00> : vector<8xf32>
    %28 = vector.multi_reduction <add>, %27, %cst_18 [1] : vector<8x128xf32> to vector<8xf32>
    %29 = vector.shape_cast %28 : vector<8xf32> to vector<8x1xf32>
    %30 = vector.broadcast %29 : vector<8x1xf32> to vector<8x128xf32>
    %31 = arith.divf %27, %30 : vector<8x128xf32>
    %c0_19 = arith.constant 0 : index
    %c0_20 = arith.constant 0 : index
    %32 = vector.load %arg8[%c0_19, %c0_20] : memref<8x128xf32, #tpu.memory_space<vmem>>, vector<8x128xf32>
    tpu.vector_store %arg8[%c0_19, %c0_20], %31 {strides = array<i32>} : memref<8x128xf32, #tpu.memory_space<vmem>>, vector<8x128xf32>,
    return
  }
  func.func @transform_0(%arg0: i32) -> (i32, i32) {
    %c0_i32 = arith.constant 0 : i32
    %c0_i32_0 = arith.constant 0 : i32
    return %arg0, %c0_i32 : i32, i32
  }
  func.func @transform_1(%arg0: i32) -> (i32, i32) {
    %c0_i32 = arith.constant 0 : i32
    %c0_i32_0 = arith.constant 0 : i32
    %c0_i32_1 = arith.constant 0 : i32
    return %c0_i32, %c0_i32_0 : i32, i32
  }
  func.func @transform_2(%arg0: i32) -> (i32, i32) {
    %c0_i32 = arith.constant 0 : i32
    %c0_i32_0 = arith.constant 0 : i32
    %c0_i32_1 = arith.constant 0 : i32
    return %c0_i32, %c0_i32_0 : i32, i32
  }
  func.func @transform_3(%arg0: i32) -> (i32, i32) {
    %c0_i32 = arith.constant 0 : i32
    %c0_i32_0 = arith.constant 0 : i32
    %c0_i32_1 = arith.constant 0 : i32
    return %c0_i32, %c0_i32_0 : i32, i32
  }
  func.func @transform_4(%arg0: i32) -> (i32, i32) {
    %c0_i32 = arith.constant 0 : i32
    %c0_i32_0 = arith.constant 0 : i32
    %c0_i32_1 = arith.constant 0 : i32
    return %c0_i32, %c0_i32_0 : i32, i32
  }
  func.func @transform_5(%arg0: i32) -> (i32, i32) {
    %c0_i32 = arith.constant 0 : i32
    %c0_i32_0 = arith.constant 0 : i32
    %c0_i32_1 = arith.constant 0 : i32
    return %c0_i32, %c0_i32_0 : i32, i32
  }
  func.func @transform_6(%arg0: i32) -> (i32, i32) {
    %c0_i32 = arith.constant 0 : i32
    %c0_i32_0 = arith.constant 0 : i32
    %c0_i32_1 = arith.constant 0 : i32
    return %c0_i32, %c0_i32_0 : i32, i32
  }
  func.func @transform_7(%arg0: i32) -> (i32, i32) {
    %c0_i32 = arith.constant 0 : i32
    %c0_i32_0 = arith.constant 0 : i32
    return %arg0, %c0_i32 : i32, i32
  }
}

</mosaic_0001>

<bundles_post_ra>
// kernel: tpu_custom_call.1
= control target key start
LH: loop header
LB: loop body
LE: loop exit
PB: predicated region body
PF: predicated region fallthrough
CT: control target
= control target key end

     0   :  { %12 = vsyncpa [#allocation3], 0  ;;  %s764_s0 = inlined_call_operand.hbm [shape: f32[8,8], index: 0, kind: input, shape index: {}]   ;;  %s765_s1 = inlined_call_operand.hbm [shape: bf16[8,128], index: 1, kind: input, shape index: {}]   ;;  %s766_s2 = inlined_call_operand.vmem [shape: f32[1,128], index: 2, kind: input, shape index: {}]   ;;  %s767_s3 = inlined_call_operand.hbm [shape: bf16[128,128], index: 3, kind: input, shape index: {}]   ;;  %s768_s4 = inlined_call_operand.vmem [shape: f32[1,128], index: 4, kind: input, shape index: {}]   ;;  %s769_s5 = inlined_call_operand.hbm [shape: bf16[128,128], index: 5, kind: input, shape index: {}]   ;;  %s770_s6 = inlined_call_operand.vmem [shape: f32[1,128], index: 6, kind: input, shape index: {}]   ;;  %s771_s7 = inlined_call_operand.hbm [shape: f32[8,128], index: 7, kind: output, shape index: {}]  }
   0x1   :  { %13 = vsyncpa [#allocation6], 0 }
   0x2   :  { %14 = vsyncpa [#allocation9], 0 }
   0x3   :  { %15 = vsyncpa [#allocation4], 0  ;;  %s623_s24 = smov [#allocation5]   ;;  %s624_s26 = smov [#allocation2]  }
   0x4   :  { %s32_s25 = sshll.u32 %s623_s24, 4  ;;  %s22_s27 = sshll.u32 %s624_s26, 4  ;;  %s33_s25 = int_to_ptr.vmem [resolvable:$true] %s32_s25  ;;  %s23_s27 = int_to_ptr.vmem [resolvable:$true] %s22_s27 }
   0x5   :  { %s505_s30 = scalar_lea.hbm %s765_s1, 64 }
   0x6   :  { %p506_p0 = scmp.ne.s32.totalorder %s765_s1, %s505_s30  ;;  %p509_p1 = scmp.lt.u32.totalorder %s505_s30, %s765_s1 }
   0x8   :  { %p511_p2 = pnand %p509_p1, %p506_p0 }
   0xa   :  { %514 = shalt.err (!%p511_p2)
}
   0xb   :  { %s515_s12 = scalar_lea.vmem %s33_s25, 64  ;;  %p520_p4 = scmp.lt.s32.totalorder %s33_s25, %s33_s25 }
   0xc   :  { %p516_p3 = scmp.ne.s32.totalorder %s33_s25, %s515_s12  ;;  %p521_p5 = scmp.lt.s32.totalorder %s515_s12, %s515_s12 }
   0xe   :  { %p522_p6 = por %p521_p5, %p520_p4 }
  0x10   :  { %p523_p7 = pnand %p522_p6, %p516_p3 }
  0x12   :  { %526 = shalt.err (!%p523_p7)
}
  0x13   :  { %35 = dma.hbm_to_vmem [thread:$0]  %s765_s1, 64, %s33_s25, [#allocation6]  }
  0x14   :  { %s527_s17 = scalar_lea.hbm %s764_s0, 128 }
  0x15   :  { %p528_p8 = scmp.ne.s32.totalorder %s764_s0, %s527_s17  ;;  %p531_p9 = scmp.lt.u32.totalorder %s527_s17, %s764_s0 }
  0x17   :  { %p533_p10 = pnand %p531_p9, %p528_p8 }
  0x19   :  { %536 = shalt.err (!%p533_p10)
}
  0x1a   :  { %s537_s22 = scalar_lea.vmem %s23_s27, 128  ;;  %p542_p12 = scmp.lt.s32.totalorder %s23_s27, %s23_s27 }
  0x1b   :  { %p538_p11 = scmp.ne.s32.totalorder %s23_s27, %s537_s22  ;;  %p543_p13 = scmp.lt.s32.totalorder %s537_s22, %s537_s22 }
  0x1d   :  { %p544_p0 = por %p543_p13, %p542_p12 }
  0x1f   :  { %p545_p1 = pnand %p544_p0, %p538_p11 }
  0x21   :  { %548 = shalt.err (!%p545_p1)
}
  0x22   :  { %25 = dma.hbm_to_vmem [thread:$0]  %s764_s0, 128, %s23_s27, [#allocation3]  }
  0x23   :  { %s625_s24 = smov [#allocation7]   ;;  %s549_s29 = scalar_lea.hbm %s767_s3, 1024 }
  0x24   :  { %s43_s25 = sshll.u32 %s625_s24, 4  ;;  %p550_p2 = scmp.ne.s32.totalorder %s767_s3, %s549_s29  ;;  %s44_s25 = int_to_ptr.vmem [resolvable:$true] %s43_s25 }
  0x25   :  { %p553_p3 = scmp.lt.u32.totalorder %s549_s29, %s767_s3 }
  0x27   :  { %p555_p4 = pnand %p553_p3, %p550_p2 }
  0x29   :  { %558 = shalt.err (!%p555_p4)
}
  0x2a   :  { %s559_s11 = scalar_lea.vmem %s44_s25, 1024  ;;  %p564_p6 = scmp.lt.s32.totalorder %s44_s25, %s44_s25 }
  0x2b   :  { %p560_p5 = scmp.ne.s32.totalorder %s44_s25, %s559_s11  ;;  %p565_p7 = scmp.lt.s32.totalorder %s559_s11, %s559_s11 }
  0x2d   :  { %p566_p8 = por %p565_p7, %p564_p6 }
  0x2f   :  { %p567_p9 = pnand %p566_p8, %p560_p5 }
  0x31   :  { %570 = shalt.err (!%p567_p9)
}
  0x32   :  { %s626_s0 = smov 64   ;;  %s627_s27 = smov 4  }
  0x33   :  { %49 = dma.hbm_to_vmem [thread:$0]  %s767_s3, 1024, %s44_s25, [#allocation6], %s626_s0, %s626_s0, %s627_s27  }
  0x34   :  { %s628_s14 = smov [#allocation8]   ;;  %s571_s18 = scalar_lea.hbm %s769_s5, 1024 }
  0x35   :  { %s57_s15 = sshll.u32 %s628_s14, 4  ;;  %p572_p10 = scmp.ne.s32.totalorder %s769_s5, %s571_s18  ;;  %s58_s15 = int_to_ptr.vmem [resolvable:$true] %s57_s15 }
  0x36   :  { %p575_p11 = scmp.lt.u32.totalorder %s571_s18, %s769_s5 }
  0x38   :  { %p577_p12 = pnand %p575_p11, %p572_p10 }
  0x3a   :  { %580 = shalt.err (!%p577_p12)
}
  0x3b   :  { %s581_s1 = scalar_lea.vmem %s58_s15, 1024  ;;  %p586_p0 = scmp.lt.s32.totalorder %s58_s15, %s58_s15 }
  0x3c   :  { %p582_p13 = scmp.ne.s32.totalorder %s58_s15, %s581_s1  ;;  %p587_p1 = scmp.lt.s32.totalorder %s581_s1, %s581_s1 }
  0x3e   :  { %p588_p2 = por %p587_p1, %p586_p0 }
  0x40   :  { %p589_p3 = pnand %p588_p2, %p582_p13 }
  0x42   :  { %592 = shalt.err (!%p589_p3)
}
  0x43   :  { %63 = dma.hbm_to_vmem [thread:$0]  %s769_s5, 1024, %s58_s15, [#allocation9], %s626_s0, %s626_s0, %s627_s27  }
  0x44   :  { %615 = dma.done.wait [#allocation3], 128  }
  0x45   :  { %616 = vsyncadd [#allocation3], 4294967168 }
  0x46   :  { %617 = dma.done.wait [#allocation6], 1088  }
  0x47   :  { %618 = vsyncadd [#allocation6], 4294966208 }
  0x48   :  { %619 = dma.done.wait [#allocation9], 1024  }
  0x49   :  { %620 = vsyncadd [#allocation9], 4294966272  ;;  %v629_v0 = vmov 0.0   ;;  %vm630_vm0 = vmmov 0   ;;  %vm93_vm1 = vcmask 1043456   ;;  %v79_v2 = vld [vmem:[#allocation2] sm:$0xff] }
  0x4a   :  { %430 = vmatprep.subr.bf16.mxu0 %v629_v0  ;;  %432 = vmatprep.mubr.msk.bf16.mxu0 %vm630_vm0, %v629_v0  ;;  %v81_v1 = vld [vmem:[#allocation5] sm:$0xf]  ;;  %v80_v4 = vpack.c.bf16 %v79_v2, %v79_v2  ;;  %v485_v5 = vld [vmem:[#allocation7] sm:$0xff]   ;;  %vm89_vm2 = vcmask 64512   ;;  %v486_v6 = vld [vmem:[#allocation7 + $0x8] sm:$0xff]  }
  0x4b   :  { %436 = vmatprep.subr.bf16.mxu1 %v629_v0  ;;  %452 = vmatprep.mubr.msk.bf16.mxu1 %vm630_vm0, %v629_v0  ;;  %v95_v3 = vsel %vm93_vm1, %v81_v1, 0  ;;  %v487_v7 = vld [vmem:[#allocation7 + $0x10] sm:$0xff]   ;;  %v488_v8 = vld [vmem:[#allocation7 + $0x18] sm:$0xff]   ;;  %v489_v9 = vld [vmem:[#allocation7 + $0x20] sm:$0xff]  }
  0x4c   :  { %431 = vmatpush3.bf16.msra.mxu0 %v95_v3  ;;  %437 = vmatpush3.bf16.msra.mxu1 %v485_v5  ;;  %v490_v10 = vld [vmem:[#allocation7 + $0x28] sm:$0xff]   ;;  %v491_v11 = vld [vmem:[#allocation7 + $0x30] sm:$0xff]   ;;  %v492_v12 = vld [vmem:[#allocation7 + $0x38] sm:$0xff]  }
  0x4d   :  { %456 = vmatprep.subr.bf16.mxu0 %v629_v0  ;;  %438 = vmatprep.subr.bf16.mxu1 %v629_v0  ;;  %v493_v13 = vld [vmem:[#allocation8] sm:$0xff]   ;;  %v494_v14 = vld [vmem:[#allocation8 + $0x8] sm:$0xff]   ;;  %v495_v15 = vld [vmem:[#allocation8 + $0x10] sm:$0xff]  }
  0x4e   :  { %v496_v16 = vld [vmem:[#allocation8 + $0x18] sm:$0xff]   ;;  %v497_v17 = vld [vmem:[#allocation8 + $0x20] sm:$0xff]   ;;  %v498_v18 = vld [vmem:[#allocation8 + $0x28] sm:$0xff]  }
  0x4f   :  { %433 = vmatmul.mubr.msk.bf16.vlgmr.msra.gmra.mrb[0].mxu0 %vm89_vm2, %v80_v4  ;;  %v390_v19 = vld [vmem:[%s766_s2] ss:$0 sm:$0xff]  ;;  %v500_v28 = vld [vmem:[#allocation8 + $0x38] sm:$0xff]  }
  0x50   :  { %472 = vmatprep.mubr.msk.bf16.mxu0 %vm630_vm0, %v629_v0  ;;  %439 = vmatpush3.bf16.msra.mxu1 %v486_v6  ;;  %v499_v27 = vld [vmem:[#allocation8 + $0x30] sm:$0xff]  }
  0x51   :  { %440 = vmatprep.subr.bf16.mxu1 %v629_v0  ;;  %457 = vmatpush3.bf16.msra.mxu0 %v493_v13  ;;  %v392_v29 = vld [vmem:[%s768_s4] ss:$0 sm:$0xff]  ;;  %s631_s4 = smov [#allocation10]  }
  0x52   :  { %458 = vmatprep.subr.bf16.mxu0 %v629_v0  ;;  %v401_v37 = vld [vmem:[%s770_s6] ss:$0 sm:$0xff]  ;;  %s379_s29 = sshll.u32 %s631_s4, 4  ;;  %s380_s29 = int_to_ptr.vmem [resolvable:$true] %s379_s29 }
  0x53   :  { %s593_s6 = scalar_lea.vmem %s380_s29, 128  ;;  %p598_p5 = scmp.lt.s32.totalorder %s380_s29, %s380_s29 }
  0x54   :  { %441 = vmatpush3.bf16.msra.mxu1 %v487_v7  ;;  %p594_p4 = scmp.ne.s32.totalorder %s380_s29, %s593_s6  ;;  %p599_p6 = scmp.lt.s32.totalorder %s593_s6, %s593_s6 }
  0x55   :  { %442 = vmatprep.subr.bf16.mxu1 %v629_v0  ;;  %459 = vmatpush3.bf16.msra.mxu0 %v494_v14 }
  0x56   :  { %460 = vmatprep.subr.bf16.mxu0 %v629_v0  ;;  %p600_p7 = por %p599_p6, %p598_p5 }
  0x58   :  { %443 = vmatpush3.bf16.msra.mxu1 %v488_v8  ;;  %p601_p8 = pnand %p600_p7, %p594_p4 }
  0x59   :  { %444 = vmatprep.subr.bf16.mxu1 %v629_v0  ;;  %461 = vmatpush3.bf16.msra.mxu0 %v495_v15 }
  0x5a   :  { %462 = vmatprep.subr.bf16.mxu0 %v629_v0 }
  0x5c   :  { %445 = vmatpush3.bf16.msra.mxu1 %v489_v9 }
  0x5d   :  { %446 = vmatprep.subr.bf16.mxu1 %v629_v0  ;;  %463 = vmatpush3.bf16.msra.mxu0 %v496_v16 }
  0x5e   :  { %464 = vmatprep.subr.bf16.mxu0 %v629_v0 }
  0x60   :  { %447 = vmatpush3.bf16.msra.mxu1 %v490_v10 }
  0x61   :  { %448 = vmatprep.subr.bf16.mxu1 %v629_v0  ;;  %465 = vmatpush3.bf16.msra.mxu0 %v497_v17 }
  0x62   :  { %466 = vmatprep.subr.bf16.mxu0 %v629_v0 }
  0x64   :  { %449 = vmatpush3.bf16.msra.mxu1 %v491_v11 }
  0x65   :  { %450 = vmatprep.subr.bf16.mxu1 %v629_v0  ;;  %467 = vmatpush3.bf16.msra.mxu0 %v498_v18 }
  0x66   :  { %468 = vmatprep.subr.bf16.mxu0 %v629_v0 }
  0x68   :  { %451 = vmatpush3.bf16.msra.mxu1 %v492_v12 }
  0x69   :  { %469 = vmatpush3.bf16.msra.mxu0 %v499_v27 }
  0x6a   :  { %470 = vmatprep.subr.bf16.mxu0 %v629_v0 }
  0x6d   :  { %471 = vmatpush3.bf16.msra.mxu0 %v500_v28 }
 0x122   :  { %v131_v20 = vpop.f32.mrb[0].mxu0 }
 0x123   :  { %v132_v21 = vadd.f32 %v390_v19, %v131_v20  ;;  %v434_v22 = vpop.f32.mrb[1].mxu0 }
 0x124   :  { %v134_v23 = vpop.f32.mrb[2].mxu0 }
 0x125   :  { %v137_v24 = vmax.f32 %v132_v21, 0.0  ;;  %v435_v25 = vpop.f32.mrb[3].mxu0 }
 0x127   :  { %v138_v26 = vpack.c.bf16 %v137_v24, %v137_v24 }
 0x129   :  { %453 = vmatmul.mubr.bf16.vlgmr.msra.gmra.mrb[0].mxu1 %v138_v26 }
 0x1fc   :  { %v244_v30 = vpop.f32.mrb[0].mxu1 }
 0x1fd   :  { %v245_v31 = vadd.f32 %v392_v29, %v244_v30  ;;  %v454_v32 = vpop.f32.mrb[1].mxu1 }
 0x1fe   :  { %v247_v33 = vpop.f32.mrb[2].mxu1 }
 0x1ff   :  { %v250_v34 = vmax.f32 %v245_v31, 0.0  ;;  %v455_v35 = vpop.f32.mrb[3].mxu1 }
 0x201   :  { %v251_v36 = vpack.c.bf16 %v250_v34, %v250_v34 }
 0x203   :  { %473 = vmatmul.mubr.bf16.vlgmr.msra.gmra.mrb[4].mxu0 %v251_v36 }
 0x2d6   :  { %v357_v38 = vpop.f32.mrb[4].mxu0 }
 0x2d7   :  { %v358_v39 = vadd.f32 %v401_v37, %v357_v38  ;;  %v474_v40 = vpop.f32.mrb[5].mxu0 }
 0x2d8   :  { %v360_v41 = vpop.f32.mrb[6].mxu0 }
 0x2d9   :  { %363 = vmax.xlane.f32.xlu0 %v358_v39  ;;  %v475_v42 = vpop.f32.mrb[7].mxu0 }
 0x366   :  { %v364_v43 = vpop.xlane.xlu0 %363 }
 0x367   :  { %v365_v44 = vsub.f32 %v358_v39, %v364_v43 }
 0x369   :  { %v366_v45 = vmul.f32 1.442695, %v365_v44 }
 0x36b   :  { %501 = vpow2.f32 %v366_v45 }
 0x375   :  { %v502_v46 = vpop.eup %501 }
 0x376   :  { %368 = vadd.xlane.f32.xlu0 %v502_v46 }
 0x403   :  { %v369_v47 = vpop.xlane.xlu0 %368 }
 0x404   :  { %503 = vrcp.f32 %v369_v47 }
 0x40e   :  { %v504_v48 = vpop.eup %503 }
 0x40f   :  { %v371_v49 = vmul.f32 %v504_v48, %v502_v46 }
 0x411   :  { %372 = vst [vmem:[#allocation10] sm:$0xff] %v371_v49 }
 0x412   :  { %604 = shalt.err (!%p601_p8)
}
 0x413   :  { %s605_s9 = scalar_lea.hbm %s771_s7, 128 }
 0x414   :  { %p606_p9 = scmp.ne.s32.totalorder %s771_s7, %s605_s9  ;;  %p609_p10 = scmp.lt.u32.totalorder %s605_s9, %s771_s7 }
 0x416   :  { %p611_p11 = pnand %p609_p10, %p606_p9 }
 0x418   :  { %614 = shalt.err (!%p611_p11)
}
 0x419   :  { %382 = dma.vmem_to_hbm [thread:$0]  %s380_s29, 128, %s771_s7, [#allocation4]  }
 0x41a   :  { %621 = dma.done.wait [#allocation4], 128  }
 0x41b   :  { %622 = vsyncadd [#allocation4], 4294967168 }
 0x41c   :  { %386 = vsyncpa [#allocation3], 1 }
 0x41d   :  { %387 = vsyncpa [#allocation6], 1 }
 0x41e   :  { %388 = vsyncpa [#allocation9], 1 }
 0x41f   :  { %389 = vsyncpa [#allocation4], 1 }

</bundles_post_ra>
